<compile_context>
chip_gen: v6e
topology: v6e:2x2x1
jax: 0.10.0
libtpu: 0.0.40
codegen_flags: <defaults>
</compile_context>

<pallas_src>
import math

import numpy as np
import jax
import jax.numpy as jnp
from jax import lax
from jax.experimental import pallas as pl
from jax.experimental.pallas import tpu as pltpu

TEMPERATURE = 0.5


def _round_up(x, m):
    return ((x + m - 1) // m) * m


def _vmem_capacity_bytes():
    # Generation-aware VMEM cap (v5e/v6e: 128 MiB, v7x: 64 MiB per TensorCore).
    try:
        cap = int(pltpu.get_tpu_info().vmem_capacity_bytes)
        if cap > 0:
            return cap
    except Exception:
        pass
    return 64 * 2**20  # conservative fallback (v7x per-core VMEM)


def _make_normalize_kernel(scale):
    # torch F.normalize(x, dim=1, eps=1e-12): x / max(||x||, eps).
    # rsqrt(max(sumsq, eps^2)) == 1 / max(||x||, eps); `scale` = sqrt(1/T) is
    # folded in here so the main kernel never rescales the similarity tile.
    # Zero (padded) rows stay exactly zero.
    def kernel(x_ref, o_ref):
        x = x_ref[...].astype(jnp.float32)
        ssq = jnp.sum(x * x, axis=-1, keepdims=True)
        inv = lax.rsqrt(jnp.maximum(ssq, 1e-24)) * scale
        o_ref[...] = (x * inv).astype(o_ref.dtype)

    return kernel


def _make_ntxent_kernel(tile_q, tile_ko, chunk_k, b_valid):
    n_chunks = tile_ko // chunk_k

    def kernel(fq_ref, fk_ref, libq_ref, libk_ref, out_ref,
               m_sc, l_sc, ps_sc, pc_sc):
        i = pl.program_id(0)            # query (row) tile   -- "parallel"
        j = pl.program_id(1)            # key slab           -- "arbitrary"

        @pl.when(j == 0)
        def _init():
            m_sc[...] = jnp.full_like(m_sc, -1e30)
            l_sc[...] = jnp.zeros_like(l_sc)
            ps_sc[...] = jnp.zeros_like(ps_sc)
            pc_sc[...] = jnp.zeros_like(pc_sc)

        fq = fq_ref[...]                # (tile_q, D) -- hoisted, reused by all chunks
        libq = libq_ref[...]            # (1, tile_q)
        q_glb = i * tile_q + lax.broadcasted_iota(jnp.int32, (chunk_k, tile_q), 1)
        k_iota = lax.broadcasted_iota(jnp.int32, (chunk_k, tile_q), 0)
        key_base = j * tile_ko

        def body(c, carry):
            m, l, ps, pc = carry
            k0 = pl.multiple_of(c * chunk_k, chunk_k)
            fk = fk_ref[pl.ds(k0, chunk_k), :]          # (chunk_k, D)
            libk = libk_ref[pl.ds(k0, chunk_k), :]      # (chunk_k, 1)
            # sim[k, q] = <f_k, f_q> (1/T folded into both operands); contraction
            # over D on both sides (no transpose feeding the MXU), f32 accumulation.
            sim = lax.dot_general(
                fk, fq, dimension_numbers=(((1,), (1,)), ((), ())),
                preferred_element_type=jnp.float32)
            # fused in-register masking: self-pairs + padded key rows.
            k_glb = key_base + k0 + k_iota
            bad = (k_glb == q_glb) | (k_glb >= b_valid)
            lab = ((libk == libq) & jnp.logical_not(bad)).astype(jnp.float32)
            sim = jnp.where(bad, -1e30, sim)
            # Online log-sum-exp along the key (sublane) axis, lane-dense state.
            # exp(-1e30 - finite) underflows to exactly 0, and -1e30 stays finite
            # (no inf - inf), so no extra selects are needed.
            m_new = jnp.maximum(m, jnp.max(sim, axis=0, keepdims=True))
            alpha = jnp.exp(m - m_new)
            l_new = alpha * l + jnp.sum(jnp.exp(sim - m_new), axis=0, keepdims=True)
            ps_new = ps + jnp.sum(sim * lab, axis=0, keepdims=True)
            pc_new = pc + jnp.sum(lab, axis=0, keepdims=True)
            return m_new, l_new, ps_new, pc_new

        m, l, ps, pc = lax.fori_loop(
            0, n_chunks, body,
            (m_sc[...], l_sc[...], ps_sc[...], pc_sc[...]),
            unroll=n_chunks <= 8)
        m_sc[...] = m
        l_sc[...] = l
        ps_sc[...] = ps
        pc_sc[...] = pc

        @pl.when(j == pl.num_programs(1) - 1)
        def _finalize():
            # -sum_pos log_softmax = pos_count*(m + log denom) - sum_pos sim
            row = pc_sc[...] * (m_sc[...] + jnp.log(l_sc[...])) - ps_sc[...]
            qg = i * tile_q + lax.broadcasted_iota(jnp.int32, (1, tile_q), 1)
            row = jnp.where(qg < b_valid, row, 0.0)
            out_ref[...] = row.reshape(1, 1, tile_q)

    return kernel


def ntxent_loss(features, lib_ids, temperature=TEMPERATURE,
                matmul_dtype=jnp.bfloat16):
    B, D = features.shape
    dsz = jnp.dtype(matmul_dtype).itemsize
    in_dsz = jnp.dtype(features.dtype).itemsize
    vmem_cap = _vmem_capacity_bytes()

    # --- tiling ---------------------------------------------------------------
    # Row (query/lane) tile: big enough to amortise the ~0.35us grid-step
    # overhead, but keep >=2 row tiles when the batch allows (megacore).
    if B <= 256:
        tile_q = 128
    elif B <= 1024:
        tile_q = 256
    else:
        tile_q = 512
    chunk_k = 128                     # in-kernel key sub-chunk (sublane dim)
    b0 = _round_up(max(B, 1), tile_q)

    # Key slab: whole padded key matrix when it fits the per-core VMEM budget
    # (counting double buffering), otherwise the largest multiple of tile_q
    # that does; any remaining key iteration stays on the grid ("arbitrary").
    q_bytes = 2 * tile_q * D * dsz
    slab_budget = max(0, int(0.45 * vmem_cap) - q_bytes)
    rows_fit = slab_budget // max(1, 2 * D * dsz)
    max_slab_rows = max(chunk_k, (rows_fit // chunk_k) * chunk_k)
    if b0 <= max_slab_rows:
        tile_ko = b0
    elif max_slab_rows >= tile_q:
        tile_ko = (max_slab_rows // tile_q) * tile_q
    else:
        tile_ko = chunk_k             # minimal slab; divides tile_q
    b_pad = _round_up(b0, tile_ko) if tile_ko > tile_q else b0
    n_q = b_pad // tile_q
    n_ko = b_pad // tile_ko

    # --- pad inputs -------------------------------------------------------------
    feats = features                  # native dtype; cast happens on-chip
    lib = lib_ids.reshape(B, 1).astype(jnp.int32)
    if b_pad != B:
        feats = jnp.pad(feats, ((0, b_pad - B), (0, 0)))
        lib = jnp.pad(lib, ((0, b_pad - B), (0, 0)),
                      constant_values=np.iinfo(np.int32).min)
    lib_t = lib.reshape(1, b_pad)     # pre-transposed copy for the query axis

    # --- pre-pass: per-row L2 normalize (x sqrt(1/T)), emit matmul dtype --------
    norm_blk_bytes = 2 * tile_q * D * (in_dsz + dsz)     # double-buffered in+out
    tile_n = tile_q if norm_blk_bytes <= int(0.4 * vmem_cap) else 128
    norm_vmem = int(min(int(0.9 * vmem_cap),
                        max(4 * tile_n * D * (in_dsz + dsz), 16 * 2**20)))
    fn = pl.pallas_call(
        _make_normalize_kernel(math.sqrt(1.0 / float(temperature))),
        out_shape=jax.ShapeDtypeStruct((b_pad, D), matmul_dtype),
        grid=(b_pad // tile_n,),
        in_specs=[pl.BlockSpec((tile_n, D), lambda i: (i, 0))],
        out_specs=pl.BlockSpec((tile_n, D), lambda i: (i, 0)),
        compiler_params=pltpu.CompilerParams(
            dimension_semantics=("parallel",),
            vmem_limit_bytes=norm_vmem),
    )(feats)

    # --- main tiled loss kernel ---------------------------------------------------
    need = (2 * tile_ko * D * dsz        # key slab (double buffered)
            + 2 * tile_q * D * dsz       # query tile (double buffered)
            + 2 * (tile_ko + tile_q) * 4  # lib-id blocks
            + 2 * tile_q * 4             # output block
            + 4 * tile_q * 4             # running LSE state
            + 4 * chunk_k * tile_q * 4)  # headroom for in-flight sim values
    vmem_limit = int(min(int(0.9 * vmem_cap), max(need + (8 << 20), 24 << 20)))

    kernel = _make_ntxent_kernel(tile_q, tile_ko, chunk_k, B)
    key_passes = n_q if n_ko > 1 else 1
    partial = pl.pallas_call(
        kernel,
        out_shape=jax.ShapeDtypeStruct((n_q, 1, tile_q), jnp.float32),
        grid_spec=pltpu.PrefetchScalarGridSpec(
            num_scalar_prefetch=0,
            grid=(n_q, n_ko),                                 # (row tile, key slab)
            in_specs=[
                pl.BlockSpec((tile_q, D), lambda i, j: (i, 0)),    # query features
                pl.BlockSpec((tile_ko, D), lambda i, j: (j, 0)),   # key slab
                pl.BlockSpec((1, tile_q), lambda i, j: (0, i)),    # lib ids (queries)
                pl.BlockSpec((tile_ko, 1), lambda i, j: (j, 0)),   # lib ids (keys)
            ],
            out_specs=pl.BlockSpec((1, 1, tile_q), lambda i, j: (i, 0, 0)),
            scratch_shapes=[pltpu.VMEM((1, tile_q), jnp.float32)] * 4),
        compiler_params=pltpu.CompilerParams(
            dimension_semantics=("parallel", "arbitrary"),
            vmem_limit_bytes=vmem_limit),
        cost_estimate=pl.CostEstimate(
            flops=2 * b_pad * b_pad * D,
            transcendentals=b_pad * b_pad,
            bytes_accessed=(1 + key_passes) * b_pad * D * dsz
                           + (1 + key_passes) * b_pad * 4 + n_q * tile_q * 4),
    )(fn, fn, lib_t, lib)

    return jnp.sum(partial) / B


def ntxent_loss_ref_numpy(features, lib_ids, temperature=TEMPERATURE):
    """Pure numpy reference reproducing the PyTorch forward exactly."""
    f = np.asarray(features, dtype=np.float32)
    ids = np.asarray(lib_ids)
    B = f.shape[0]
    fnrm = f / np.maximum(np.linalg.norm(f, axis=1, keepdims=True), 1e-12)
    sim = fnrm @ fnrm.T / temperature
    labels = (ids[:, None] == ids[None, :]).astype(np.float32)
    mask = np.eye(B, dtype=bool)
    labels_od = labels[~mask].reshape(B, B - 1)
    sim_od = sim[~mask].reshape(B, B - 1)
    m = sim_od.max(axis=-1, keepdims=True)
    log_sm = sim_od - m - np.log(np.exp(sim_od - m).sum(axis=-1, keepdims=True))
    loss = -(labels_od * log_sm).sum()
    return np.float32(loss / B)


if __name__ == "__main__":
    key = jax.random.PRNGKey(0)

    # small single-tile case (matches the module's toy shapes)
    B, D = 8, 32
    kf, kl, key = jax.random.split(key, 3)
    features = jax.random.normal(kf, (B, D), dtype=jnp.float32)
    lib_ids = jax.random.randint(kl, (B,), 0, 3, dtype=jnp.int32)
    loss = jax.block_until_ready(ntxent_loss(features, lib_ids))
    ref = ntxent_loss_ref_numpy(np.asarray(features), np.asarray(lib_ids))
    # bf16 MXU operands -> loosened tolerance (the loss itself is well-conditioned)
    np.testing.assert_allclose(np.asarray(loss), ref, rtol=2e-2, atol=2e-2)

    # multi-tile case: 2 row tiles, 4 in-kernel key chunks, diagonal-tile and
    # padded-key masking (B=300 pads to 512 with a fully VMEM-resident key slab)
    B2, D2 = 300, 64
    kf2, kl2 = jax.random.split(key)
    features2 = jax.random.normal(kf2, (B2, D2), dtype=jnp.float32)
    lib_ids2 = jax.random.randint(kl2, (B2,), 0, 5, dtype=jnp.int32)
    loss2 = jax.block_until_ready(ntxent_loss(features2, lib_ids2))
    ref2 = ntxent_loss_ref_numpy(np.asarray(features2), np.asarray(lib_ids2))
    np.testing.assert_allclose(np.asarray(loss2), ref2, rtol=2e-2, atol=2e-2)

    print("KERNEL_OK")
</pallas_src>

<mosaic_0001>
module attributes {stable_mosaic.version = 11 : i64} {
  func.func @kernel(%arg0: i32, %arg1: memref<128x32xf32, #tpu.memory_space<vmem>>, %arg2: memref<128x32xbf16, #tpu.memory_space<vmem>>) attributes {dimension_semantics = [#tpu.dimension_semantics<parallel>], iteration_bounds = array<i64: 1>, scalar_prefetch = 0 : i64, scratch_operands = 0 : i64, tpu.core_type = #tpu.core_type<tc>, window_params = [{transform_indices = @transform_0, window_bounds = array<i64: 128, 32>}, {transform_indices = @transform_1, window_bounds = array<i64: 128, 32>}]} {
    %c0 = arith.constant 0 : index
    %c0_0 = arith.constant 0 : index
    %0 = vector.load %arg1[%c0, %c0_0] : memref<128x32xf32, #tpu.memory_space<vmem>>, vector<128x32xf32>
    %1 = arith.mulf %0, %0 : vector<128x32xf32>
    %cst = arith.constant dense<0.000000e+00> : vector<128xf32>
    %2 = vector.multi_reduction <add>, %1, %cst [1] : vector<128x32xf32> to vector<128xf32>
    %3 = vector.shape_cast %2 : vector<128xf32> to vector<128x1xf32>
    %cst_1 = arith.constant 1.000000e-24 : f32
    %4 = vector.broadcast %cst_1 : f32 to vector<128x1xf32>
    %5 = arith.maximumf %3, %4 : vector<128x1xf32>
    %6 = math.rsqrt %5 : vector<128x1xf32>
    %cst_2 = arith.constant 1.41421354 : f32
    %7 = vector.broadcast %cst_2 : f32 to vector<128x1xf32>
    %8 = arith.mulf %6, %7 : vector<128x1xf32>
    %9 = vector.broadcast %8 : vector<128x1xf32> to vector<128x32xf32>
    %10 = arith.mulf %0, %9 : vector<128x32xf32>
    %11 = arith.truncf %10 : vector<128x32xf32> to vector<128x32xbf16>
    %c0_3 = arith.constant 0 : index
    %c0_4 = arith.constant 0 : index
    %12 = vector.load %arg2[%c0_3, %c0_4] : memref<128x32xbf16, #tpu.memory_space<vmem>>, vector<128x32xbf16>
    tpu.vector_store %arg2[%c0_3, %c0_4], %11 {strides = array<i32>} : memref<128x32xbf16, #tpu.memory_space<vmem>>, vector<128x32xbf16>,
    return
  }
  func.func @transform_0(%arg0: i32) -> (i32, i32) {
    %c0_i32 = arith.constant 0 : i32
    %c0_i32_0 = arith.constant 0 : i32
    return %arg0, %c0_i32 : i32, i32
  }
  func.func @transform_1(%arg0: i32) -> (i32, i32) {
    %c0_i32 = arith.constant 0 : i32
    %c0_i32_0 = arith.constant 0 : i32
    return %arg0, %c0_i32 : i32, i32
  }
}

</mosaic_0001>

<bundles_post_ra>
// kernel: tpu_custom_call.1
= control target key start
LH: loop header
LB: loop body
LE: loop exit
PB: predicated region body
PF: predicated region fallthrough
CT: control target
= control target key end

     0   :  { %vm40_vm0 = vcmask 261120   ;;  %vm217_vm1 = vcmask 257024   ;;  %s520_s0 = inlined_call_operand.vmem [shape: f32[128,32], index: 0, kind: input, shape index: {}]   ;;  %s521_s1 = inlined_call_operand.vmem [shape: bf16[128,32], index: 1, kind: output, shape index: {}]  }
   0x1   :  { %v315_v0 = vld [vmem:[%s520_s0 + $0x10] sm:$0xff]  ;;  %v320_v1 = vld [vmem:[%s520_s0] sm:$0xff]  ;;  %v325_v2 = vld [vmem:[%s520_s0 + $0x18] sm:$0xff] }
   0x2   :  { %v26_v3 = vmul.f32 %v315_v0, %v315_v0  ;;  %v24_v4 = vmul.f32 %v320_v1, %v320_v1  ;;  %v27_v5 = vmul.f32 %v325_v2, %v325_v2  ;;  %v336_v6 = vld [vmem:[%s520_s0 + $0x8] sm:$0xff]  ;;  %v348_v9 = vld [vmem:[%s520_s0 + $0x20] sm:$0xff]  ;;  %v361_v16 = vld [vmem:[%s520_s0 + $0x38] sm:$0xff] }
   0x3   :  { %v25_v7 = vmul.f32 %v336_v6, %v336_v6  ;;  %v343_v8 = vld [vmem:[%s520_s0 + $0x28] sm:$0xff]  ;;  %v28_v15 = vmul.f32 %v348_v9, %v348_v9  ;;  %v366_v17 = vld [vmem:[%s520_s0 + $0x30] sm:$0xff]  ;;  %v31_v20 = vmul.f32 %v361_v16, %v361_v16  ;;  %v382_v23 = vld [vmem:[%s520_s0 + $0x40] sm:$0xff] }
   0x4   :  { %v47_v10 = vsel %vm40_vm0, %v26_v3, 0.0  ;;  %v41_v11 = vsel %vm40_vm0, %v24_v4, 0.0  ;;  %v50_v12 = vsel %vm40_vm0, %v27_v5, 0.0  ;;  %v29_v14 = vmul.f32 %v343_v8, %v343_v8  ;;  %v377_v22 = vld [vmem:[%s520_s0 + $0x48] sm:$0xff]  ;;  %v393_v28 = vld [vmem:[%s520_s0 + $0x58] sm:$0xff]  ;;  %v398_v29 = vld [vmem:[%s520_s0 + $0x50] sm:$0xff] }
   0x5   :  { %48 = vadd.xlane.f32.xlu1 %v47_v10  ;;  %42 = vadd.xlane.f32.xlu0 %v41_v11  ;;  %v44_v13 = vsel %vm40_vm0, %v25_v7, 0.0  ;;  %v53_v19 = vsel %vm40_vm0, %v28_v15, 0.0  ;;  %v30_v21 = vmul.f32 %v366_v17, %v366_v17  ;;  %v62_v24 = vsel %vm40_vm0, %v31_v20, 0.0  ;;  %v409_v34 = vld [vmem:[%s520_s0 + $0x68] sm:$0xff]  ;;  %v414_v35 = vld [vmem:[%s520_s0 + $0x60] sm:$0xff]  ;;  %v425_v40 = vld [vmem:[%s520_s0 + $0x78] sm:$0xff] }
   0x6   :  { %v56_v18 = vsel %vm40_vm0, %v29_v14, 0.0  ;;  %v33_v26 = vmul.f32 %v377_v22, %v377_v22  ;;  %v32_v27 = vmul.f32 %v382_v23, %v382_v23  ;;  %v35_v32 = vmul.f32 %v393_v28, %v393_v28  ;;  %v430_v41 = vld [vmem:[%s520_s0 + $0x70] sm:$0xff] }
   0x7   :  { %v59_v25 = vsel %vm40_vm0, %v30_v21, 0.0  ;;  %v34_v33 = vmul.f32 %v398_v29, %v398_v29  ;;  %v37_v38 = vmul.f32 %v409_v34, %v409_v34  ;;  %v36_v39 = vmul.f32 %v414_v35, %v414_v35 }
   0x8   :  { %v68_v30 = vsel %vm40_vm0, %v33_v26, 0.0  ;;  %v65_v31 = vsel %vm40_vm0, %v32_v27, 0.0  ;;  %v74_v36 = vsel %vm40_vm0, %v35_v32, 0.0  ;;  %v39_v44 = vmul.f32 %v425_v40, %v425_v40 }
   0x9   :  { %51 = vadd.xlane.f32.xlu1 %v50_v12  ;;  %45 = vadd.xlane.f32.xlu0 %v44_v13  ;;  %v71_v37 = vsel %vm40_vm0, %v34_v33, 0.0  ;;  %v80_v42 = vsel %vm40_vm0, %v37_v38, 0.0  ;;  %v77_v43 = vsel %vm40_vm0, %v36_v39, 0.0  ;;  %v38_v45 = vmul.f32 %v430_v41, %v430_v41 }
   0xa   :  { %v86_v46 = vsel %vm40_vm0, %v39_v44, 0.0 }
   0xb   :  { %v83_v47 = vsel %vm40_vm0, %v38_v45, 0.0 }
   0xd   :  { %57 = vadd.xlane.f32.xlu1 %v56_v18  ;;  %54 = vadd.xlane.f32.xlu0 %v53_v19 }
  0x11   :  { %63 = vadd.xlane.f32.xlu1 %v62_v24  ;;  %60 = vadd.xlane.f32.xlu0 %v59_v25 }
  0x15   :  { %69 = vadd.xlane.f32.xlu1 %v68_v30  ;;  %66 = vadd.xlane.f32.xlu0 %v65_v31 }
  0x19   :  { %75 = vadd.xlane.f32.xlu1 %v74_v36  ;;  %72 = vadd.xlane.f32.xlu0 %v71_v37 }
  0x1d   :  { %81 = vadd.xlane.f32.xlu1 %v80_v42  ;;  %78 = vadd.xlane.f32.xlu0 %v77_v43 }
  0x21   :  { %87 = vadd.xlane.f32.xlu1 %v86_v46  ;;  %84 = vadd.xlane.f32.xlu0 %v83_v47 }
  0x8e   :  { %v49_v48 = vpop.xlane.xlu1 %48  ;;  %v43_v49 = vpop.xlane.xlu0 %42 }
  0x8f   :  { %v91_v50 = vmax.f32 %v49_v48, 1e-24  ;;  %v89_v51 = vmax.f32 %v43_v49, 1e-24 }
  0x91   :  { %270 = vrsqrt.f32 %v91_v50 }
  0x92   :  { %272 = vrsqrt.f32 %v89_v51  ;;  %v52_v52 = vpop.xlane.xlu1 %51  ;;  %v46_v53 = vpop.xlane.xlu0 %45 }
  0x93   :  { %v92_v54 = vmax.f32 %v52_v52, 1e-24  ;;  %v90_v55 = vmax.f32 %v46_v53, 1e-24 }
  0x95   :  { %274 = vrsqrt.f32 %v92_v54 }
  0x96   :  { %276 = vrsqrt.f32 %v90_v55  ;;  %v58_v56 = vpop.xlane.xlu1 %57  ;;  %v55_v57 = vpop.xlane.xlu0 %54 }
  0x97   :  { %v94_v58 = vmax.f32 %v58_v56, 1e-24  ;;  %v93_v59 = vmax.f32 %v55_v57, 1e-24 }
  0x99   :  { %278 = vrsqrt.f32 %v94_v58 }
  0x9a   :  { %280 = vrsqrt.f32 %v93_v59  ;;  %v64_v60 = vpop.xlane.xlu1 %63  ;;  %v61_v61 = vpop.xlane.xlu0 %60 }
  0x9b   :  { %v96_v62 = vmax.f32 %v64_v60, 1e-24  ;;  %v95_v63 = vmax.f32 %v61_v61, 1e-24 }
  0x9d   :  { %282 = vrsqrt.f32 %v96_v62 }
  0x9e   :  { %v271_v3 = vpop.eup %270  ;;  %284 = vrsqrt.f32 %v95_v63  ;;  %v70_v4 = vpop.xlane.xlu1 %69 }
  0x9f   :  { %v67_v5 = vpop.xlane.xlu0 %66  ;;  %v273_v7 = vpop.eup %272  ;;  %v123_v10 = vmul.f32 1.4142135, %v271_v3  ;;  %v98_v11 = vmax.f32 %v70_v4, 1e-24 }
  0xa0   :  { %v97_v12 = vmax.f32 %v67_v5, 1e-24  ;;  %v121_v13 = vmul.f32 1.4142135, %v273_v7 }
  0xa1   :  { %v139_v14 = vmul.f32 %v123_v10, %v315_v0  ;;  %286 = vrsqrt.f32 %v98_v11 }
  0xa2   :  { %v275_v15 = vpop.eup %274  ;;  %v137_v18 = vmul.f32 %v121_v13, %v320_v1  ;;  %288 = vrsqrt.f32 %v97_v12  ;;  %v76_v19 = vpop.xlane.xlu1 %75 }
  0xa3   :  { %v73_v20 = vpop.xlane.xlu0 %72  ;;  %v277_v21 = vpop.eup %276  ;;  %v256_v24 = vpack.c.bf16 %v139_v14, %v139_v14  ;;  %v124_v25 = vmul.f32 1.4142135, %v275_v15  ;;  %v100_v26 = vmax.f32 %v76_v19, 1e-24 }
  0xa4   :  { %v99_v27 = vmax.f32 %v73_v20, 1e-24  ;;  %v254_v30 = vpack.c.bf16 %v137_v18, %v137_v18  ;;  %v122_v31 = vmul.f32 1.4142135, %v277_v21 }
  0xa5   :  { %220 = vst.msk [vmem:[%s521_s1 + $0x8] sm:$0xf] %vm217_vm1, %v256_v24  ;;  %v140_v0 = vmul.f32 %v124_v25, %v325_v2  ;;  %290 = vrsqrt.f32 %v100_v26 }
  0xa6   :  { %v279_v32 = vpop.eup %278  ;;  %218 = vst.msk [vmem:[%s521_s1] sm:$0xf] %vm217_vm1, %v254_v30  ;;  %v138_v1 = vmul.f32 %v122_v31, %v336_v6  ;;  %292 = vrsqrt.f32 %v99_v27  ;;  %v82_v33 = vpop.xlane.xlu1 %81 }
  0xa7   :  { %v79_v36 = vpop.xlane.xlu0 %78  ;;  %v281_v37 = vpop.eup %280  ;;  %v257_v38 = vpack.c.bf16 %v140_v0, %v140_v0  ;;  %v126_v39 = vmul.f32 1.4142135, %v279_v32  ;;  %v102_v42 = vmax.f32 %v82_v33, 1e-24 }
  0xa8   :  { %v101_v43 = vmax.f32 %v79_v36, 1e-24  ;;  %v255_v44 = vpack.c.bf16 %v138_v1, %v138_v1  ;;  %v125_v45 = vmul.f32 1.4142135, %v281_v37 }
  0xa9   :  { %221 = vst.msk [vmem:[%s521_s1 + $0xc] sm:$0xf] %vm217_vm1, %v257_v38  ;;  %v142_v2 = vmul.f32 %v126_v39, %v343_v8  ;;  %294 = vrsqrt.f32 %v102_v42 }
  0xaa   :  { %v283_v46 = vpop.eup %282  ;;  %219 = vst.msk [vmem:[%s521_s1 + $0x4] sm:$0xf] %vm217_vm1, %v255_v44  ;;  %v141_v6 = vmul.f32 %v125_v45, %v348_v9  ;;  %296 = vrsqrt.f32 %v101_v43  ;;  %v88_v47 = vpop.xlane.xlu1 %87 }
  0xab   :  { %v85_v48 = vpop.xlane.xlu0 %84  ;;  %v285_v49 = vpop.eup %284  ;;  %v259_v50 = vpack.c.bf16 %v142_v2, %v142_v2  ;;  %v128_v51 = vmul.f32 1.4142135, %v283_v46  ;;  %v104_v52 = vmax.f32 %v88_v47, 1e-24 }
  0xac   :  { %v103_v53 = vmax.f32 %v85_v48, 1e-24  ;;  %v258_v54 = vpack.c.bf16 %v141_v6, %v141_v6  ;;  %v127_v55 = vmul.f32 1.4142135, %v285_v49 }
  0xad   :  { %223 = vst.msk [vmem:[%s521_s1 + $0x14] sm:$0xf] %vm217_vm1, %v259_v50  ;;  %v144_v8 = vmul.f32 %v128_v51, %v361_v16  ;;  %298 = vrsqrt.f32 %v104_v52 }
  0xae   :  { %v287_v56 = vpop.eup %286  ;;  %222 = vst.msk [vmem:[%s521_s1 + $0x10] sm:$0xf] %vm217_vm1, %v258_v54  ;;  %v143_v9 = vmul.f32 %v127_v55, %v366_v17  ;;  %300 = vrsqrt.f32 %v103_v53 }
  0xaf   :  { %v289_v57 = vpop.eup %288  ;;  %v261_v58 = vpack.c.bf16 %v144_v8, %v144_v8  ;;  %v130_v59 = vmul.f32 1.4142135, %v287_v56 }
  0xb0   :  { %v260_v60 = vpack.c.bf16 %v143_v9, %v143_v9  ;;  %v129_v61 = vmul.f32 1.4142135, %v289_v57 }
  0xb1   :  { %225 = vst.msk [vmem:[%s521_s1 + $0x1c] sm:$0xf] %vm217_vm1, %v261_v58  ;;  %v146_v16 = vmul.f32 %v130_v59, %v377_v22 }
  0xb2   :  { %v291_v62 = vpop.eup %290  ;;  %224 = vst.msk [vmem:[%s521_s1 + $0x18] sm:$0xf] %vm217_vm1, %v260_v60  ;;  %v145_v17 = vmul.f32 %v129_v61, %v382_v23 }
  0xb3   :  { %v293_v63 = vpop.eup %292  ;;  %v263_v3 = vpack.c.bf16 %v146_v16, %v146_v16  ;;  %v132_v4 = vmul.f32 1.4142135, %v291_v62 }
  0xb4   :  { %v262_v5 = vpack.c.bf16 %v145_v17, %v145_v17  ;;  %v131_v7 = vmul.f32 1.4142135, %v293_v63 }
  0xb5   :  { %227 = vst.msk [vmem:[%s521_s1 + $0x24] sm:$0xf] %vm217_vm1, %v263_v3  ;;  %v148_v22 = vmul.f32 %v132_v4, %v393_v28 }
  0xb6   :  { %v295_v10 = vpop.eup %294  ;;  %226 = vst.msk [vmem:[%s521_s1 + $0x20] sm:$0xf] %vm217_vm1, %v262_v5  ;;  %v147_v23 = vmul.f32 %v131_v7, %v398_v29 }
  0xb7   :  { %v297_v11 = vpop.eup %296  ;;  %v265_v12 = vpack.c.bf16 %v148_v22, %v148_v22  ;;  %v134_v13 = vmul.f32 1.4142135, %v295_v10 }
  0xb8   :  { %v264_v14 = vpack.c.bf16 %v147_v23, %v147_v23  ;;  %v133_v15 = vmul.f32 1.4142135, %v297_v11 }
  0xb9   :  { %229 = vst.msk [vmem:[%s521_s1 + $0x2c] sm:$0xf] %vm217_vm1, %v265_v12  ;;  %v150_v28 = vmul.f32 %v134_v13, %v409_v34 }
  0xba   :  { %v299_v18 = vpop.eup %298  ;;  %228 = vst.msk [vmem:[%s521_s1 + $0x28] sm:$0xf] %vm217_vm1, %v264_v14  ;;  %v149_v29 = vmul.f32 %v133_v15, %v414_v35 }
  0xbb   :  { %v301_v19 = vpop.eup %300  ;;  %v267_v20 = vpack.c.bf16 %v150_v28, %v150_v28  ;;  %v136_v21 = vmul.f32 1.4142135, %v299_v18 }
  0xbc   :  { %v266_v24 = vpack.c.bf16 %v149_v29, %v149_v29  ;;  %v135_v25 = vmul.f32 1.4142135, %v301_v19 }
  0xbd   :  { %231 = vst.msk [vmem:[%s521_s1 + $0x34] sm:$0xf] %vm217_vm1, %v267_v20  ;;  %v152_v34 = vmul.f32 %v136_v21, %v425_v40 }
  0xbe   :  { %230 = vst.msk [vmem:[%s521_s1 + $0x30] sm:$0xf] %vm217_vm1, %v266_v24  ;;  %v151_v26 = vmul.f32 %v135_v25, %v430_v41 }
  0xbf   :  { %v269_v35 = vpack.c.bf16 %v152_v34, %v152_v34 }
  0xc0   :  { %v268_v27 = vpack.c.bf16 %v151_v26, %v151_v26 }
  0xc1   :  { %233 = vst.msk [vmem:[%s521_s1 + $0x3c] sm:$0xf] %vm217_vm1, %v269_v35 }
  0xc2   :  { %232 = vst.msk [vmem:[%s521_s1 + $0x38] sm:$0xf] %vm217_vm1, %v268_v27 }

</bundles_post_ra>
